<compile_context>
chip_gen: v6e
topology: v6e:2x2x1
jax: 0.10.0
libtpu: 0.0.40
codegen_flags: <defaults>
</compile_context>

<pallas_src>
import functools

import jax
import jax.numpy as jnp
from jax.experimental import pallas as pl
from jax.experimental.pallas import tpu as pltpu

LANE = 128            # vreg lane width
SUBL = 8              # f32 sublane count
MAX_ROW_BLOCK = 4096  # (4096, 128) f32 = 2 MiB per input block
NUM_SHARDS = 2        # leading 'parallel' grid axis -> both TCs on v7x


def _l1_sum_kernel(p_ref, a_ref, out_ref, acc_ref, *,
                   row_block, n_rows, steps, needs_mask):
    s = pl.program_id(0)   # shard (parallel axis)
    i = pl.program_id(1)   # reduction step within shard (arbitrary axis)

    @pl.when(i == 0)
    def _():
        acc_ref[...] = jnp.zeros_like(acc_ref)

    diff = jnp.abs(p_ref[...].astype(jnp.float32) -
                   a_ref[...].astype(jnp.float32))

    if needs_mask:
        # Rows past n_rows (partial last block, or duplicate clamped blocks)
        # hold garbage VMEM -> zero them before accumulating.  This is pure
        # VPU work and hides completely under the HBM DMA stream.
        logical_block = s * steps + i
        row0 = logical_block * row_block
        local_rows = jax.lax.broadcasted_iota(jnp.int32, (row_block, LANE), 0)
        diff = jnp.where((row0 + local_rows) < n_rows, diff, 0.0)

    # Vector accumulate: fold the row block into one (8, 128) vreg partial
    # with pure VPU adds (reshape stays on (8,128) tile boundaries -> free);
    # the single cross-lane reduce is deferred to the wrapper.
    acc_ref[...] += jnp.sum(diff.reshape(row_block // SUBL, SUBL, LANE), axis=0)

    @pl.when(i == pl.num_programs(1) - 1)
    def _():
        out_ref[...] = acc_ref[...]


def _l1_partial_sums(p2d, a2d, max_row_block=MAX_ROW_BLOCK):
    """p2d/a2d: (R, LANE) slabs with R % 8 == 0. Returns (shards, 8, 128) partials."""
    R = p2d.shape[0]
    row_block = min(max_row_block, R)
    total_blocks = pl.cdiv(R, row_block)
    shards = NUM_SHARDS if total_blocks >= NUM_SHARDS else 1
    steps = pl.cdiv(total_blocks, shards)
    needs_mask = (R % row_block != 0) or (shards * steps != total_blocks)

    def in_map(s, i):
        # Clamp so duplicate / trailing steps never DMA out of bounds
        # (their contribution is masked to zero in the kernel).
        return (jnp.minimum(s * steps + i, total_blocks - 1), 0)

    kernel = functools.partial(
        _l1_sum_kernel,
        row_block=row_block, n_rows=R, steps=steps, needs_mask=needs_mask)

    bytes_in = (p2d.size * p2d.dtype.itemsize +
                a2d.size * a2d.dtype.itemsize)
    cost = pl.CostEstimate(
        flops=3 * p2d.size,
        transcendentals=0,
        bytes_accessed=bytes_in + shards * SUBL * LANE * 4)

    return pl.pallas_call(
        kernel,
        out_shape=jax.ShapeDtypeStruct((shards, SUBL, LANE), jnp.float32),
        grid_spec=pltpu.PrefetchScalarGridSpec(
            num_scalar_prefetch=0,
            grid=(shards, steps),
            in_specs=[
                pl.BlockSpec((row_block, LANE), in_map),
                pl.BlockSpec((row_block, LANE), in_map),
            ],
            out_specs=pl.BlockSpec((None, SUBL, LANE), lambda s, i: (s, 0, 0)),
            scratch_shapes=[pltpu.VMEM((SUBL, LANE), jnp.float32)],
        ),
        compiler_params=pltpu.CompilerParams(
            dimension_semantics=("parallel", "arbitrary"),
            vmem_limit_bytes=32 * 1024 * 1024,
        ),
        cost_estimate=cost,
    )(p2d, a2d)


def pixel_loss(predicted, actual, reduction: str = "mean", *,
               _max_row_block: int = MAX_ROW_BLOCK):
    """JAX/Pallas equivalent of PixelLoss.forward (nn.L1Loss)."""
    if predicted.shape != actual.shape:
        raise ValueError("Predicted and actual must have the same shape")

    if reduction == "none":
        # TODO(synk): 'none' is a trivial elementwise map with no reduction;
        # done in plain JAX (preserves input dtype, like torch).
        return jnp.abs(predicted - actual)

    n_elems = predicted.size
    out_dtype = jnp.result_type(predicted.dtype, actual.dtype)

    flat_p = predicted.reshape(-1)
    flat_a = actual.reshape(-1)

    # Only pad to the minimal (8 * 128)-element slab granularity, identically
    # in both tensors so padded |diff| contributions are exactly 0.  Typical
    # image tensors need no padding and the reshape below is free.
    align = SUBL * LANE
    rem = n_elems % align
    if rem:
        pad = align - rem
        flat_p = jnp.pad(flat_p, (0, pad))
        flat_a = jnp.pad(flat_a, (0, pad))

    p2d = flat_p.reshape(-1, LANE)
    a2d = flat_a.reshape(-1, LANE)

    partials = _l1_partial_sums(p2d, a2d, max_row_block=_max_row_block)
    total = jnp.sum(partials)   # tiny (shards, 8, 128) final reduce

    if reduction == "mean":
        return (total / n_elems).astype(out_dtype)
    elif reduction == "sum":
        return total.astype(out_dtype)
    else:
        raise ValueError(f"Unknown reduction: {reduction}")


if __name__ == "__main__":
    key = jax.random.PRNGKey(0)
    k1, k2, k3, k4 = jax.random.split(key, 4)

    # Primary case: small NCHW tensors as used by the UNIT-GAN pixel loss.
    predicted = jax.random.normal(k1, (2, 4, 16, 16), dtype=jnp.float32)
    actual = jax.random.normal(k2, (2, 4, 16, 16), dtype=jnp.float32)

    loss = jax.block_until_ready(pixel_loss(predicted, actual, reduction="mean"))
    ref = jnp.mean(jnp.abs(predicted - actual))
    assert jnp.allclose(loss, ref, rtol=1e-6, atol=1e-6), (loss, ref)

    # Secondary case: exercise the sharded grid + ragged-block masking path
    # with a tiny row block (3 blocks over 2 shards -> one clamped/masked step).
    p2 = jax.random.normal(k3, (2, 4, 16, 24), dtype=jnp.float32)
    a2 = jax.random.normal(k4, (2, 4, 16, 24), dtype=jnp.float32)
    loss2 = jax.block_until_ready(
        pixel_loss(p2, a2, reduction="sum", _max_row_block=8))
    ref2 = jnp.sum(jnp.abs(p2 - a2))
    assert jnp.allclose(loss2, ref2, rtol=1e-5, atol=1e-5), (loss2, ref2)

    print("KERNEL_OK")
</pallas_src>

<mosaic_0001>
module attributes {stable_mosaic.version = 11 : i64} {
  func.func @_l1_sum_kernel(%arg0: i32, %arg1: i32, %arg2: memref<16x128xf32, #tpu.memory_space<vmem>>, %arg3: memref<16x128xf32, #tpu.memory_space<vmem>>, %arg4: memref<1x8x128xf32, #tpu.memory_space<vmem>>, %arg5: memref<8x128xf32, #tpu.memory_space<vmem>>) attributes {dimension_semantics = [#tpu.dimension_semantics<parallel>, #tpu.dimension_semantics<arbitrary>], iteration_bounds = array<i64: 1, 1>, scalar_prefetch = 0 : i64, scratch_operands = 1 : i64, tpu.core_type = #tpu.core_type<tc>, window_params = [{transform_indices = @transform_0, window_bounds = array<i64: 16, 128>}, {transform_indices = @transform_1, window_bounds = array<i64: 16, 128>}, {transform_indices = @transform_2, window_bounds = array<i64: 1, 8, 128>}]} {
    %c0_i32 = arith.constant 0 : i32
    %0 = arith.cmpi eq, %arg1, %c0_i32 : i32
    %1 = arith.extui %0 : i1 to i32
    %c0_i32_0 = arith.constant 0 : i32
    %2 = arith.cmpi ne, %1, %c0_i32_0 : i32
    scf.if %2 {
      %cst_10 = arith.constant 0.000000e+00 : f32
      %15 = vector.broadcast %cst_10 : f32 to vector<8x128xf32>
      %c0_11 = arith.constant 0 : index
      %c0_12 = arith.constant 0 : index
      %16 = vector.load %arg5[%c0_11, %c0_12] : memref<8x128xf32, #tpu.memory_space<vmem>>, vector<8x128xf32>
      tpu.vector_store %arg5[%c0_11, %c0_12], %15 {strides = array<i32>} : memref<8x128xf32, #tpu.memory_space<vmem>>, vector<8x128xf32>,
    } else {
    }
    %c0 = arith.constant 0 : index
    %c0_1 = arith.constant 0 : index
    %3 = vector.load %arg2[%c0, %c0_1] : memref<16x128xf32, #tpu.memory_space<vmem>>, vector<16x128xf32>
    %c0_2 = arith.constant 0 : index
    %c0_3 = arith.constant 0 : index
    %4 = vector.load %arg3[%c0_2, %c0_3] : memref<16x128xf32, #tpu.memory_space<vmem>>, vector<16x128xf32>
    %5 = arith.subf %3, %4 : vector<16x128xf32>
    %6 = math.absf %5 : vector<16x128xf32>
    %c0_4 = arith.constant 0 : index
    %c0_5 = arith.constant 0 : index
    %7 = vector.load %arg5[%c0_4, %c0_5] : memref<8x128xf32, #tpu.memory_space<vmem>>, vector<8x128xf32>
    %8 = vector.shape_cast %6 : vector<16x128xf32> to vector<2x8x128xf32>
    %cst = arith.constant dense<0.000000e+00> : vector<8x128xf32>
    %9 = vector.multi_reduction <add>, %8, %cst [0] : vector<2x8x128xf32> to vector<8x128xf32>
    %10 = arith.addf %7, %9 : vector<8x128xf32>
    %c0_6 = arith.constant 0 : index
    %c0_7 = arith.constant 0 : index
    %11 = vector.load %arg5[%c0_6, %c0_7] : memref<8x128xf32, #tpu.memory_space<vmem>>, vector<8x128xf32>
    tpu.vector_store %arg5[%c0_6, %c0_7], %10 {strides = array<i32>} : memref<8x128xf32, #tpu.memory_space<vmem>>, vector<8x128xf32>,
    %c0_i32_8 = arith.constant 0 : i32
    %12 = arith.cmpi eq, %arg1, %c0_i32_8 : i32
    %13 = arith.extui %12 : i1 to i32
    %c0_i32_9 = arith.constant 0 : i32
    %14 = arith.cmpi ne, %13, %c0_i32_9 : i32
    scf.if %14 {
      %c0_10 = arith.constant 0 : index
      %c0_11 = arith.constant 0 : index
      %15 = vector.load %arg5[%c0_10, %c0_11] : memref<8x128xf32, #tpu.memory_space<vmem>>, vector<8x128xf32>
      %c0_12 = arith.constant 0 : index
      %c0_13 = arith.constant 0 : index
      %c0_14 = arith.constant 0 : index
      %16 = vector.load %arg4[%c0_12, %c0_13, %c0_14] : memref<1x8x128xf32, #tpu.memory_space<vmem>>, vector<1x8x128xf32>
      %17 = vector.shape_cast %16 : vector<1x8x128xf32> to vector<8x128xf32>
      %18 = vector.shape_cast %15 : vector<8x128xf32> to vector<1x8x128xf32>
      tpu.vector_store %arg4[%c0_12, %c0_13, %c0_14], %18 {strides = array<i32>} : memref<1x8x128xf32, #tpu.memory_space<vmem>>, vector<1x8x128xf32>,
    } else {
    }
    return
  }
  func.func @transform_0(%arg0: i32, %arg1: i32) -> (i32, i32) {
    %c1_i32 = arith.constant 1 : i32
    %0 = arith.muli %arg0, %c1_i32 : i32
    %1 = arith.addi %0, %arg1 : i32
    %c0_i32 = arith.constant 0 : i32
    %2 = arith.minsi %1, %c0_i32 : i32
    %c0_i32_0 = arith.constant 0 : i32
    %c0_i32_1 = arith.constant 0 : i32
    return %2, %c0_i32_0 : i32, i32
  }
  func.func @transform_1(%arg0: i32, %arg1: i32) -> (i32, i32) {
    %c1_i32 = arith.constant 1 : i32
    %0 = arith.muli %arg0, %c1_i32 : i32
    %1 = arith.addi %0, %arg1 : i32
    %c0_i32 = arith.constant 0 : i32
    %2 = arith.minsi %1, %c0_i32 : i32
    %c0_i32_0 = arith.constant 0 : i32
    %c0_i32_1 = arith.constant 0 : i32
    return %2, %c0_i32_0 : i32, i32
  }
  func.func @transform_2(%arg0: i32, %arg1: i32) -> (i32, i32, i32) {
    %c0_i32 = arith.constant 0 : i32
    %c0_i32_0 = arith.constant 0 : i32
    %c0_i32_1 = arith.constant 0 : i32
    return %arg0, %c0_i32, %c0_i32_0 : i32, i32, i32
  }
}

</mosaic_0001>

<bundles_post_ra>
// kernel: tpu_custom_call.1
= control target key start
LH: loop header
LB: loop body
LE: loop exit
PB: predicated region body
PF: predicated region fallthrough
CT: control target
= control target key end

     0   :  { %7 = vsyncpa [#allocation4], 0  ;;  %s202_s0 = inlined_call_operand.hbm [shape: f32[16,128], index: 0, kind: input, shape index: {}]   ;;  %s203_s1 = inlined_call_operand.hbm [shape: f32[16,128], index: 1, kind: input, shape index: {}]   ;;  %s204_s2 = inlined_call_operand.hbm [shape: f32[1,8,128], index: 2, kind: output, shape index: {}]  }
   0x1   :  { %8 = vsyncpa [#allocation7], 0 }
   0x2   :  { %9 = vsyncpa [#allocation5], 0  ;;  %s173_s9 = smov [#allocation3]  }
   0x3   :  { %s21_s10 = sshll.u32 %s173_s9, 4  ;;  %s22_s10 = int_to_ptr.vmem [resolvable:$true] %s21_s10 }
   0x4   :  { %s115_s11 = scalar_lea.vmem %s22_s10, 256  ;;  %p120_p1 = scmp.lt.s32.totalorder %s22_s10, %s22_s10 }
   0x5   :  { %p116_p0 = scmp.ne.s32.totalorder %s22_s10, %s115_s11  ;;  %p121_p2 = scmp.lt.s32.totalorder %s115_s11, %s115_s11 }
   0x7   :  { %p122_p3 = por %p121_p2, %p120_p1 }
   0x9   :  { %p123_p4 = pnand %p122_p3, %p116_p0 }
   0xb   :  { %126 = shalt.err (!%p123_p4)
}
   0xc   :  { %s174_s12 = smov 128   ;;  %s175_s13 = smov 8  }
   0xd   :  { %27 = dma.hbm_to_vmem [thread:$0]  %s202_s0, 256, %s22_s10, [#allocation4], %s174_s12, %s174_s12, %s175_s13  }
   0xe   :  { %s176_s16 = smov [#allocation6]  }
   0xf   :  { %s39_s17 = sshll.u32 %s176_s16, 4  ;;  %s40_s17 = int_to_ptr.vmem [resolvable:$true] %s39_s17 }
  0x10   :  { %s135_s18 = scalar_lea.vmem %s40_s17, 256  ;;  %p140_p6 = scmp.lt.s32.totalorder %s40_s17, %s40_s17 }
  0x11   :  { %p136_p5 = scmp.ne.s32.totalorder %s40_s17, %s135_s18  ;;  %p141_p7 = scmp.lt.s32.totalorder %s135_s18, %s135_s18 }
  0x13   :  { %p142_p8 = por %p141_p7, %p140_p6 }
  0x15   :  { %p143_p9 = pnand %p142_p8, %p136_p5 }
  0x17   :  { %146 = shalt.err (!%p143_p9)
}
  0x18   :  { %45 = dma.hbm_to_vmem [thread:$0]  %s203_s1, 256, %s40_s17, [#allocation7], %s174_s12, %s174_s12, %s175_s13  }
  0x19   :  { %167 = dma.done.wait [#allocation4], 256  }
  0x1a   :  { %168 = vsyncadd [#allocation4], 4294967040 }
  0x1b   :  { %169 = dma.done.wait [#allocation7], 256  }
  0x1c   :  { %170 = vsyncadd [#allocation7], 4294967040  ;;  %v65_v0 = vld [vmem:[#allocation3] sm:$0xff]  ;;  %v66_v1 = vld [vmem:[#allocation3 + $0x8] sm:$0xff]  ;;  %s177_s0 = smov [#allocation8]  }
  0x1d   :  { %v67_v2 = vld [vmem:[#allocation6] sm:$0xff]  ;;  %v68_v3 = vld [vmem:[#allocation6 + $0x8] sm:$0xff]  ;;  %s88_s21 = sshll.u32 %s177_s0, 4  ;;  %s89_s21 = int_to_ptr.vmem [resolvable:$true] %s88_s21 }
  0x1e   :  { %v69_v4 = vsub.f32 %v65_v0, %v67_v2  ;;  %v70_v5 = vsub.f32 %v66_v1, %v68_v3  ;;  %s147_s22 = scalar_lea.vmem %s89_s21, 128  ;;  %p152_p11 = scmp.lt.s32.totalorder %s89_s21, %s89_s21 }
  0x1f   :  { %p148_p10 = scmp.ne.s32.totalorder %s89_s21, %s147_s22  ;;  %p153_p12 = scmp.lt.s32.totalorder %s147_s22, %s147_s22 }
  0x20   :  { %v71_v6 = vand.u32 2147483647, %v69_v4  ;;  %v72_v7 = vand.u32 2147483647, %v70_v5 }
  0x21   :  { %p154_p13 = por %p153_p12, %p152_p11 }
  0x22   :  { %v74_v8 = vadd.f32 %v72_v7, %v71_v6 }
  0x23   :  { %p155_p0 = pnand %p154_p13, %p148_p10 }
  0x24   :  { %81 = vst [vmem:[#allocation8] sm:$0xff] %v74_v8 }
  0x25   :  { %158 = shalt.err (!%p155_p0)
}
  0x26   :  { %91 = dma.vmem_to_hbm [thread:$0]  %s89_s21, 128, %s204_s2, [#allocation5]  }
  0x27   :  { %171 = dma.done.wait [#allocation5], 128  }
  0x28   :  { %172 = vsyncadd [#allocation5], 4294967168 }
  0x29   :  { %95 = vsyncpa [#allocation4], 1 }
  0x2a   :  { %96 = vsyncpa [#allocation7], 1 }
  0x2b   :  { %97 = vsyncpa [#allocation5], 1 }

</bundles_post_ra>
